<compile_context>
chip_gen: v6e
topology: v6e:2x2x1
jax: 0.10.0
libtpu: 0.0.40
codegen_flags: <defaults>
</compile_context>

<pallas_src>
import jax
import jax.numpy as jnp
from jax.experimental import pallas as pl
from jax.experimental.pallas import tpu as pltpu

LANE = 128
SUB = 8                      # f32 sublanes in one vreg
BLOCK_ROWS_MAX = 8192        # 8192 * 128 * 4B = 4 MiB per input per grid step


def _round_up(n, m):
    return (n + m - 1) // m * m


def _num_tensorcores():
    """2 on v7x (2 TensorCores per Pallas device), else 1 (v5e / v6e)."""
    try:
        kind = (jax.devices()[0].device_kind or "").lower()
    except Exception:
        return 1
    if "7x" in kind or "v7" in kind:
        return 2
    return 1


def _as_lane_rows(a):
    """Flatten and view as (rows, 128) lane-dense rows.

    Zero-copy whenever numel % 128 == 0 (typical image tensors). Otherwise pads
    with zeros to the next multiple of 128 (zeros contribute 0 to both terms).
    """
    flat = a.reshape(-1)
    n = flat.shape[0]
    n_pad = _round_up(n, LANE)
    if n_pad != n:
        # TODO(synk): handle the <128-element tail with an in-kernel lane mask
        # instead of this full-tensor pad copy (only fires when numel % 128 != 0).
        flat = jnp.pad(flat, (0, n_pad - n))
    return flat.reshape(-1, LANE)


def _make_kernel(*, block_rows, nb_per_core, nb, rows, need_mask, acc_grouped):
    def kernel(xr_ref, x_ref, mu_ref, lv_ref, mse_ref, kld_ref, acc_ref):
        c = pl.program_id(0)          # core axis (CORE_PARALLEL on v7x)
        i = pl.program_id(1)          # sequential row-block axis (per core)

        @pl.when(i == 0)
        def _init():
            acc_ref[...] = jnp.zeros_like(acc_ref)
            # KLD term: mu/logvar are tiny and fully VMEM-resident (constant
            # block index -> loaded once); computed once per core and broadcast
            # into that core's partial-output tile.
            mu = mu_ref[...].astype(jnp.float32)
            lv = lv_ref[...].astype(jnp.float32)
            kld = -0.5 * jnp.sum(1.0 + lv - mu * mu - jnp.exp(lv))
            kld_ref[...] = jnp.full(kld_ref.shape, kld, jnp.float32)

        # Cast in-register (HBM traffic stays at the source dtype width).
        xr = xr_ref[...].astype(jnp.float32)
        xv = x_ref[...].astype(jnp.float32)
        d = xr - xv
        sq = d * d

        def _accumulate(vals):
            if acc_grouped:
                # Fold the (block_rows, 128) tile onto one (8, 128) vreg with
                # pure VPU adds; the single cross-lane reduce is in the epilogue.
                acc_ref[...] += vals.reshape(-1, SUB, LANE).sum(axis=0)
            else:
                # Tiny-array fallback (block_rows < 8): acc is (block_rows, 128).
                acc_ref[...] += vals

        if need_mask:
            g = c * nb_per_core + i          # global (unclamped) block index
            on_edge = g >= nb - 1            # last real block or phantom block

            @pl.when(jnp.logical_not(on_edge))
            def _full():
                _accumulate(sq)

            @pl.when(on_edge)
            def _edge():
                valid = rows - g * block_rows    # <=0 for phantom blocks
                row_idx = jax.lax.broadcasted_iota(jnp.int32, sq.shape, 0)
                _accumulate(jnp.where(row_idx < valid, sq, 0.0))
        else:
            _accumulate(sq)

        @pl.when(i == nb_per_core - 1)
        def _finalize():
            partial = jnp.sum(acc_ref[...])      # single cross-lane reduce
            mse_ref[...] = jnp.full(mse_ref.shape, partial, jnp.float32)

    return kernel


@jax.jit
def kldmse(x_recon, x, mu, logvar):
    """Returns (mse_loss, kld_loss), matching PyTorch KLDMSE.forward."""
    assert x_recon.shape == x.shape
    assert mu.shape == logvar.shape

    # --- main (MSE) operands: lane-dense (rows, 128) views, no copy if aligned ---
    xr2 = _as_lane_rows(x_recon)
    x2 = _as_lane_rows(x)
    rows = xr2.shape[0]

    # --- small KLD operands (fully resident, untiled) ---
    mu2 = _as_lane_rows(mu)
    lv2 = _as_lane_rows(logvar)
    rk = mu2.shape[0]

    # Sublane granularity the tiled BlockSpec must respect for the input dtype
    # (8 for 4-byte, 16 for bf16, 32 for int8/fp8). Full-array-dims blocks are exempt.
    itemsize = jnp.dtype(x_recon.dtype).itemsize
    sub_req = SUB * max(1, 4 // itemsize)

    if rows % sub_req == 0:
        block_rows = min(BLOCK_ROWS_MAX, rows)
    elif rows > sub_req:
        block_rows = min(BLOCK_ROWS_MAX, (rows // sub_req) * sub_req)
    else:
        block_rows = rows            # single partial block == full array dims

    nb = pl.cdiv(rows, block_rows)           # total row blocks
    ncores = min(_num_tensorcores(), nb)     # no core with only phantom work
    nb_per_core = pl.cdiv(nb, ncores)
    need_mask = (ncores * nb_per_core * block_rows != rows)
    acc_grouped = (block_rows % SUB == 0)
    acc_rows = SUB if acc_grouped else block_rows

    def row_map(c, i):
        g = c * nb_per_core + i
        return (jnp.minimum(g, nb - 1), 0)   # clamp phantom block; masked in-kernel

    if ncores > 1:
        dim_sem = (pltpu.CORE_PARALLEL, pltpu.ARBITRARY)   # real 2-TC split (v7x)
    else:
        dim_sem = (pltpu.ARBITRARY, pltpu.ARBITRARY)

    kernel = _make_kernel(block_rows=block_rows, nb_per_core=nb_per_core,
                          nb=nb, rows=rows, need_mask=need_mask,
                          acc_grouped=acc_grouped)

    mse_parts, kld_parts = pl.pallas_call(
        kernel,
        out_shape=(jax.ShapeDtypeStruct((ncores, SUB, LANE), jnp.float32),
                   jax.ShapeDtypeStruct((ncores, SUB, LANE), jnp.float32)),
        grid=(ncores, nb_per_core),
        in_specs=[
            pl.BlockSpec((block_rows, LANE), row_map),
            pl.BlockSpec((block_rows, LANE), row_map),
            pl.BlockSpec((rk, LANE), lambda c, i: (0, 0)),
            pl.BlockSpec((rk, LANE), lambda c, i: (0, 0)),
        ],
        out_specs=(
            pl.BlockSpec((1, SUB, LANE), lambda c, i: (c, 0, 0)),
            pl.BlockSpec((1, SUB, LANE), lambda c, i: (c, 0, 0)),
        ),
        scratch_shapes=[pltpu.VMEM((acc_rows, LANE), jnp.float32)],
        compiler_params=pltpu.CompilerParams(
            dimension_semantics=dim_sem,
            vmem_limit_bytes=32 * 1024 * 1024),
    )(xr2, x2, mu2, lv2)

    mse_loss = jnp.sum(mse_parts[:, 0, 0])   # add per-core partials
    kld_loss = kld_parts[0, 0, 0]            # same value on every core
    return mse_loss, kld_loss


if __name__ == "__main__":
    key = jax.random.PRNGKey(0)
    k1, k2, k3, k4 = jax.random.split(key, 4)

    # Small shapes consistent with a VAE forward: images NCHW, latents (B, Z).
    x_recon = jax.random.normal(k1, (2, 4, 16, 16), dtype=jnp.float32)
    x = jax.random.normal(k2, (2, 4, 16, 16), dtype=jnp.float32)
    mu = jax.random.normal(k3, (2, 32), dtype=jnp.float32)
    logvar = 0.1 * jax.random.normal(k4, (2, 32), dtype=jnp.float32)

    mse_loss, kld_loss = kldmse(x_recon, x, mu, logvar)
    jax.block_until_ready((mse_loss, kld_loss))

    # Pure-JAX reference check.
    ref_mse = jnp.sum((x_recon - x) ** 2)
    ref_kld = -0.5 * jnp.sum(1.0 + logvar - mu ** 2 - jnp.exp(logvar))
    assert jnp.allclose(mse_loss, ref_mse, rtol=1e-5, atol=1e-4), (mse_loss, ref_mse)
    assert jnp.allclose(kld_loss, ref_kld, rtol=1e-5, atol=1e-4), (kld_loss, ref_kld)

    print("KERNEL_OK")
</pallas_src>

<mosaic_0001>
module attributes {stable_mosaic.version = 11 : i64} {
  func.func @kernel(%arg0: i32, %arg1: i32, %arg2: memref<16x128xf32, #tpu.memory_space<vmem>>, %arg3: memref<16x128xf32, #tpu.memory_space<vmem>>, %arg4: memref<1x128xf32, #tpu.memory_space<vmem>>, %arg5: memref<1x128xf32, #tpu.memory_space<vmem>>, %arg6: memref<1x8x128xf32, #tpu.memory_space<vmem>>, %arg7: memref<1x8x128xf32, #tpu.memory_space<vmem>>, %arg8: memref<8x128xf32, #tpu.memory_space<vmem>>) attributes {dimension_semantics = [#tpu.dimension_semantics<arbitrary>, #tpu.dimension_semantics<arbitrary>], iteration_bounds = array<i64: 1, 1>, scalar_prefetch = 0 : i64, scratch_operands = 1 : i64, tpu.core_type = #tpu.core_type<tc>, window_params = [{transform_indices = @transform_0, window_bounds = array<i64: 16, 128>}, {transform_indices = @transform_1, window_bounds = array<i64: 16, 128>}, {pipeline_mode = #tpu.pipeline_mode<synchronous>, transform_indices = @transform_2, window_bounds = array<i64: 1, 128>}, {pipeline_mode = #tpu.pipeline_mode<synchronous>, transform_indices = @transform_3, window_bounds = array<i64: 1, 128>}, {transform_indices = @transform_4, window_bounds = array<i64: 1, 8, 128>}, {transform_indices = @transform_5, window_bounds = array<i64: 1, 8, 128>}]} {
    %c0_i32 = arith.constant 0 : i32
    %0 = arith.cmpi eq, %arg1, %c0_i32 : i32
    %1 = arith.extui %0 : i1 to i32
    %c0_i32_0 = arith.constant 0 : i32
    %2 = arith.cmpi ne, %1, %c0_i32_0 : i32
    scf.if %2 {
      %cst_10 = arith.constant 0.000000e+00 : f32
      %15 = vector.broadcast %cst_10 : f32 to vector<8x128xf32>
      %c0_11 = arith.constant 0 : index
      %c0_12 = arith.constant 0 : index
      %16 = vector.load %arg8[%c0_11, %c0_12] : memref<8x128xf32, #tpu.memory_space<vmem>>, vector<8x128xf32>
      tpu.vector_store %arg8[%c0_11, %c0_12], %15 {strides = array<i32>} : memref<8x128xf32, #tpu.memory_space<vmem>>, vector<8x128xf32>,
      %c0_13 = arith.constant 0 : index
      %c0_14 = arith.constant 0 : index
      %17 = vector.load %arg4[%c0_13, %c0_14] : memref<1x128xf32, #tpu.memory_space<vmem>>, vector<1x128xf32>
      %c0_15 = arith.constant 0 : index
      %c0_16 = arith.constant 0 : index
      %18 = vector.load %arg5[%c0_15, %c0_16] : memref<1x128xf32, #tpu.memory_space<vmem>>, vector<1x128xf32>
      %cst_17 = arith.constant 1.000000e+00 : f32
      %19 = vector.broadcast %cst_17 : f32 to vector<1x128xf32>
      %20 = arith.addf %19, %18 : vector<1x128xf32>
      %21 = arith.mulf %17, %17 : vector<1x128xf32>
      %22 = arith.subf %20, %21 : vector<1x128xf32>
      %23 = math.exp %18 : vector<1x128xf32>
      %24 = arith.subf %22, %23 : vector<1x128xf32>
      %25 = vector.shape_cast %24 : vector<1x128xf32> to vector<1x1x128xf32>
      %cst_18 = arith.constant dense<0.000000e+00> : vector<1xf32>
      %26 = vector.multi_reduction <add>, %25, %cst_18 [1, 2] : vector<1x1x128xf32> to vector<1xf32>
      %27 = vector.shape_cast %26 : vector<1xf32> to vector<1x1x1xf32>
      %28 = vector.extract %27[0, 0, 0] : f32 from vector<1x1x1xf32>
      %cst_19 = arith.constant -5.000000e-01 : f32
      %29 = arith.mulf %cst_19, %28 : f32
      %30 = vector.broadcast %29 : f32 to vector<1x8x128xf32>
      %c0_20 = arith.constant 0 : index
      %c0_21 = arith.constant 0 : index
      %c0_22 = arith.constant 0 : index
      %31 = vector.load %arg7[%c0_20, %c0_21, %c0_22] : memref<1x8x128xf32, #tpu.memory_space<vmem>>, vector<1x8x128xf32>
      tpu.vector_store %arg7[%c0_20, %c0_21, %c0_22], %30 {strides = array<i32>} : memref<1x8x128xf32, #tpu.memory_space<vmem>>, vector<1x8x128xf32>,
    } else {
    }
    %c0 = arith.constant 0 : index
    %c0_1 = arith.constant 0 : index
    %3 = vector.load %arg2[%c0, %c0_1] : memref<16x128xf32, #tpu.memory_space<vmem>>, vector<16x128xf32>
    %c0_2 = arith.constant 0 : index
    %c0_3 = arith.constant 0 : index
    %4 = vector.load %arg3[%c0_2, %c0_3] : memref<16x128xf32, #tpu.memory_space<vmem>>, vector<16x128xf32>
    %5 = arith.subf %3, %4 : vector<16x128xf32>
    %6 = arith.mulf %5, %5 : vector<16x128xf32>
    %c0_4 = arith.constant 0 : index
    %c0_5 = arith.constant 0 : index
    %7 = vector.load %arg8[%c0_4, %c0_5] : memref<8x128xf32, #tpu.memory_space<vmem>>, vector<8x128xf32>
    %8 = vector.shape_cast %6 : vector<16x128xf32> to vector<2x8x128xf32>
    %cst = arith.constant dense<0.000000e+00> : vector<8x128xf32>
    %9 = vector.multi_reduction <add>, %8, %cst [0] : vector<2x8x128xf32> to vector<8x128xf32>
    %10 = arith.addf %7, %9 : vector<8x128xf32>
    %c0_6 = arith.constant 0 : index
    %c0_7 = arith.constant 0 : index
    %11 = vector.load %arg8[%c0_6, %c0_7] : memref<8x128xf32, #tpu.memory_space<vmem>>, vector<8x128xf32>
    tpu.vector_store %arg8[%c0_6, %c0_7], %10 {strides = array<i32>} : memref<8x128xf32, #tpu.memory_space<vmem>>, vector<8x128xf32>,
    %c0_i32_8 = arith.constant 0 : i32
    %12 = arith.cmpi eq, %arg1, %c0_i32_8 : i32
    %13 = arith.extui %12 : i1 to i32
    %c0_i32_9 = arith.constant 0 : i32
    %14 = arith.cmpi ne, %13, %c0_i32_9 : i32
    scf.if %14 {
      %c0_10 = arith.constant 0 : index
      %c0_11 = arith.constant 0 : index
      %15 = vector.load %arg8[%c0_10, %c0_11] : memref<8x128xf32, #tpu.memory_space<vmem>>, vector<8x128xf32>
      %16 = vector.shape_cast %15 : vector<8x128xf32> to vector<1x8x128xf32>
      %cst_12 = arith.constant dense<0.000000e+00> : vector<1xf32>
      %17 = vector.multi_reduction <add>, %16, %cst_12 [1, 2] : vector<1x8x128xf32> to vector<1xf32>
      %18 = vector.shape_cast %17 : vector<1xf32> to vector<1x1x1xf32>
      %19 = vector.extract %18[0, 0, 0] : f32 from vector<1x1x1xf32>
      %20 = vector.broadcast %19 : f32 to vector<1x8x128xf32>
      %c0_13 = arith.constant 0 : index
      %c0_14 = arith.constant 0 : index
      %c0_15 = arith.constant 0 : index
      %21 = vector.load %arg6[%c0_13, %c0_14, %c0_15] : memref<1x8x128xf32, #tpu.memory_space<vmem>>, vector<1x8x128xf32>
      tpu.vector_store %arg6[%c0_13, %c0_14, %c0_15], %20 {strides = array<i32>} : memref<1x8x128xf32, #tpu.memory_space<vmem>>, vector<1x8x128xf32>,
    } else {
    }
    return
  }
  func.func @transform_0(%arg0: i32, %arg1: i32) -> (i32, i32) {
    %c1_i32 = arith.constant 1 : i32
    %0 = arith.muli %arg0, %c1_i32 : i32
    %1 = arith.addi %0, %arg1 : i32
    %c0_i32 = arith.constant 0 : i32
    %2 = arith.minsi %1, %c0_i32 : i32
    %c0_i32_0 = arith.constant 0 : i32
    %c0_i32_1 = arith.constant 0 : i32
    return %2, %c0_i32_0 : i32, i32
  }
  func.func @transform_1(%arg0: i32, %arg1: i32) -> (i32, i32) {
    %c1_i32 = arith.constant 1 : i32
    %0 = arith.muli %arg0, %c1_i32 : i32
    %1 = arith.addi %0, %arg1 : i32
    %c0_i32 = arith.constant 0 : i32
    %2 = arith.minsi %1, %c0_i32 : i32
    %c0_i32_0 = arith.constant 0 : i32
    %c0_i32_1 = arith.constant 0 : i32
    return %2, %c0_i32_0 : i32, i32
  }
  func.func @transform_2(%arg0: i32, %arg1: i32) -> (i32, i32) {
    %c0_i32 = arith.constant 0 : i32
    %c0_i32_0 = arith.constant 0 : i32
    %c0_i32_1 = arith.constant 0 : i32
    return %c0_i32, %c0_i32_0 : i32, i32
  }
  func.func @transform_3(%arg0: i32, %arg1: i32) -> (i32, i32) {
    %c0_i32 = arith.constant 0 : i32
    %c0_i32_0 = arith.constant 0 : i32
    %c0_i32_1 = arith.constant 0 : i32
    return %c0_i32, %c0_i32_0 : i32, i32
  }
  func.func @transform_4(%arg0: i32, %arg1: i32) -> (i32, i32, i32) {
    %c0_i32 = arith.constant 0 : i32
    %c0_i32_0 = arith.constant 0 : i32
    %c0_i32_1 = arith.constant 0 : i32
    return %arg0, %c0_i32, %c0_i32_0 : i32, i32, i32
  }
  func.func @transform_5(%arg0: i32, %arg1: i32) -> (i32, i32, i32) {
    %c0_i32 = arith.constant 0 : i32
    %c0_i32_0 = arith.constant 0 : i32
    %c0_i32_1 = arith.constant 0 : i32
    return %arg0, %c0_i32, %c0_i32_0 : i32, i32, i32
  }
}

</mosaic_0001>

<bundles_post_ra>
// kernel: kldmse.1
= control target key start
LH: loop header
LB: loop body
LE: loop exit
PB: predicated region body
PF: predicated region fallthrough
CT: control target
= control target key end

     0   :  { %vm96_vm0 = vcmask 1040384   ;;  %s217_s3 = inlined_call_operand.vmem [shape: f32[1,128], index: 3, kind: input, shape index: {}]   ;;  %s218_s2 = inlined_call_operand.vmem [shape: f32[1,128], index: 2, kind: input, shape index: {}]   ;;  %s219_s0 = inlined_call_operand.vmem [shape: f32[16,128], index: 0, kind: input, shape index: {}]   ;;  %s220_s1 = inlined_call_operand.vmem [shape: f32[16,128], index: 1, kind: input, shape index: {}]   ;;  %s221_s5 = inlined_call_operand.vmem [shape: f32[1,8,128], index: 5, kind: output, shape index: {1}]   ;;  %s222_s4 = inlined_call_operand.vmem [shape: f32[1,8,128], index: 4, kind: output, shape index: {0}]  }
   0x1   :  { %v89_v0 = vld [vmem:[%s217_s3] sm:$0x1]  ;;  %v111_v6 = vld [vmem:[%s219_s0 + $0x8] sm:$0xff] }
   0x2   :  { %v93_v1 = vmul.f32 1.442695, %v89_v0  ;;  %v88_v2 = vld [vmem:[%s218_s2] sm:$0x1]  ;;  %v90_v4 = vadd.f32 1.0, %v89_v0  ;;  %v113_v8 = vld [vmem:[%s220_s1 + $0x8] sm:$0xff] }
   0x3   :  { %v110_v3 = vld [vmem:[%s219_s0] sm:$0xff]  ;;  %v91_v5 = vmul.f32 %v88_v2, %v88_v2  ;;  %v115_v10 = vsub.f32 %v111_v6, %v113_v8 }
   0x4   :  { %161 = vpow2.f32 %v93_v1  ;;  %v112_v7 = vld [vmem:[%s220_s1] sm:$0xff] }
   0x5   :  { %v114_v9 = vsub.f32 %v110_v3, %v112_v7  ;;  %v92_v11 = vsub.f32 %v90_v4, %v91_v5  ;;  %v117_v14 = vmul.f32 %v115_v10, %v115_v10 }
   0x7   :  { %v116_v13 = vmul.f32 %v114_v9, %v114_v9 }
   0x9   :  { %v119_v17 = vadd.f32 %v117_v14, %v116_v13 }
  0x11   :  { %v162_v12 = vpop.eup %161 }
  0x12   :  { %v95_v15 = vsub.f32 %v92_v11, %v162_v12 }
  0x14   :  { %v97_v16 = vsel %vm96_vm0, %v95_v15, 0.0 }
  0x15   :  { %98 = vadd.xlane.f32.xlu0 %v97_v16 }
  0x19   :  { %126 = vadd.xlane.f32.xlu0 %v119_v17 }
  0x9e   :  { %v99_v18 = vpop.xlane.xlu0 %98 }
  0x9f   :  { %v100_v19 = vrot.slane %v99_v18, 4 }
  0xa1   :  { %v101_v20 = vadd.f32 %v100_v19, %v99_v18 }
  0xa2   :  { %v127_v21 = vpop.xlane.xlu0 %126 }
  0xa3   :  { %v102_v22 = vrot.slane %v101_v20, 2  ;;  %v128_v23 = vrot.slane %v127_v21, 4 }
  0xa5   :  { %v129_v24 = vadd.f32 %v128_v23, %v127_v21  ;;  %v103_v25 = vadd.f32 %v102_v22, %v101_v20 }
  0xa7   :  { %v130_v26 = vrot.slane %v129_v24, 2  ;;  %v104_v27 = vrot.slane %v103_v25, 1 }
  0xa9   :  { %v131_v28 = vadd.f32 %v130_v26, %v129_v24  ;;  %v105_v29 = vadd.f32 %v104_v27, %v103_v25 }
  0xab   :  { %157 = vpush %v105_v29  ;;  %v132_v30 = vrot.slane %v131_v28, 1 }
  0xad   :  { %v133_v31 = vadd.f32 %v132_v30, %v131_v28 }
  0xaf   :  { %159 = vpush %v133_v31 }
  0xdc   :  { %s158_s0 = spop %157 }
  0xdd   :  { %s107_s1 = smul.f32 -0.5, %s158_s0 }
  0xdf   :  { %v108_v32 = vstv %s107_s1 }
  0xe0   :  { %109 = vst [vmem:[%s221_s5] sm:$0xff] %v108_v32  ;;  %s160_s30 = spop %159 }
  0xe1   :  { %v135_v33 = vstv %s160_s30 }
  0xe2   :  { %136 = vst [vmem:[%s222_s4] sm:$0xff] %v135_v33 }

</bundles_post_ra>
